<compile_context>
chip_gen: v6e
topology: v6e:2x2x1
jax: 0.10.0
libtpu: 0.0.40
codegen_flags: <defaults>
</compile_context>

<pallas_src>
import functools
import numpy as np
import jax
import jax.numpy as jnp
from jax.experimental import pallas as pl
from jax.experimental.pallas import tpu as pltpu

LANE = 128        # TPU lane width
OUT_LANES = 128   # lane-dense output slab: col 0 = q1, col 1 = q2, rest pad


def _critic_kernel(obs_ref, act_ref, w_enc_ref, b_enc_ref,
                   w1f_ref, w1a_ref, b1_ref, w2_ref, b2_ref, out_ref,
                   *, n_group, block):
    # ---- encoder (approximation): bf16 MXU matmul, f32 accumulate ----------
    # The 1/255 obs scaling is folded into w_enc at parameter-prep time.
    x = obs_ref[...].astype(jnp.bfloat16)                        # (Bp, C*H*W)
    feat = jnp.dot(x, w_enc_ref[...],
                   preferred_element_type=jnp.float32)           # (Bp, F)
    feat = jnp.maximum(feat + b_enc_ref[...], 0.0)

    # ---- fused Q1+Q2 first 1x1 conv (dense on 1x1 spatial) + ReLU ----------
    # cat([feat | action]) @ W1 is computed as feat @ W1f + act @ W1a, which
    # avoids materializing the concatenation.  Output columns are laid out as
    # n_group blocks of `block` (=128) lanes each:
    #   [Q1 fields (hidden) | Q2 fields (hidden) | zero pad]   for group elem j
    h = (jnp.dot(feat, w1f_ref[...], preferred_element_type=jnp.float32)
         + jnp.dot(act_ref[...], w1a_ref[...], preferred_element_type=jnp.float32)
         + b1_ref[...])
    h = jnp.maximum(h, 0.0)                                      # (Bp, N*block)

    # ---- GroupPooling: max over the N group channels of each field ---------
    # Every slice is a full 128-lane-aligned block -> pure VPU max, no shuffles.
    g = h[:, 0:block]
    for j in range(1, n_group):
        g = jnp.maximum(g, h[:, j * block:(j + 1) * block])      # (Bp, block)

    # ---- fused Q1+Q2 final 1x1 conv into one lane-dense output slab --------
    # w2 rows [0:hidden] feed col 0 (q1), rows [hidden:2*hidden] feed col 1
    # (q2); all other rows/cols are zero.
    out_ref[...] = (jnp.dot(g, w2_ref[...],
                            preferred_element_type=jnp.float32)
                    + b2_ref[...])                               # (Bp, OUT_LANES)


def critic_forward(obs, action, params):
    """obs: (B, C, H, W) f32 in [0, 255]; action: (B, A) f32 -> (q1, q2), each (B, 1)."""
    w_enc, b_enc, w1f, w1a, b1, w2, b2 = params
    B = obs.shape[0]
    A = action.shape[1]
    F = w_enc.shape[1]                    # hidden * N
    block = w2.shape[0]                   # lane-aligned group block width (>= 2*hidden)
    n_group = w1f.shape[1] // block

    # Pad batch to a bf16-sublane-friendly multiple (16) so every vreg / MXU
    # pass is full-tile; padded rows are sliced away below.
    Bp = -(-B // 16) * 16
    obs_flat = obs.reshape(B, -1).astype(jnp.float32)
    obs_p = jnp.pad(obs_flat, ((0, Bp - B), (0, 0)))
    # Action zero-padded to a full lane group so its matmul operand is lane-dense.
    act_p = jnp.pad(action.astype(jnp.float32),
                    ((0, Bp - B), (0, w1a.shape[0] - A)))

    kernel = functools.partial(_critic_kernel, n_group=n_group, block=block)
    inputs = (obs_p, act_p, w_enc, b_enc, w1f, w1a, b1, w2, b2)

    out = pl.pallas_call(
        kernel,
        out_shape=jax.ShapeDtypeStruct((Bp, OUT_LANES), jnp.float32),
        in_specs=[pl.BlockSpec(memory_space=pltpu.MemorySpace.VMEM)
                  for _ in inputs],
        out_specs=pl.BlockSpec(memory_space=pltpu.MemorySpace.VMEM),
    )(*inputs)

    return out[:B, 0:1], out[:B, 1:2]


def critic_reference(obs, action, params):
    """Pure-JAX reference with identical math (for a correctness check)."""
    w_enc, b_enc, w1f, w1a, b1, w2, b2 = params
    B = obs.shape[0]
    block = w2.shape[0]
    n_group = w1f.shape[1] // block
    x = obs.reshape(B, -1).astype(jnp.bfloat16)
    feat = jnp.maximum(
        jnp.dot(x, w_enc, preferred_element_type=jnp.float32) + b_enc, 0.0)
    act_p = jnp.pad(action.astype(jnp.float32),
                    ((0, 0), (0, w1a.shape[0] - action.shape[1])))
    h = jnp.maximum(
        jnp.dot(feat, w1f, preferred_element_type=jnp.float32)
        + jnp.dot(act_p, w1a, preferred_element_type=jnp.float32) + b1, 0.0)
    g = jnp.max(h.reshape(B, n_group, block), axis=1)
    out = jnp.dot(g, w2, preferred_element_type=jnp.float32) + b2
    return out[:, 0:1], out[:, 1:2]


if __name__ == "__main__":
    # Shapes consistent with the module:
    #   obs_shape=(4,16,16), action_shape=(5,), hidden_dim=encoder_feature_dim=32, N=4 (C4)
    B = 2
    obs_shape = (4, 16, 16)
    action_dim = 5
    hidden_dim = 32
    N = 4
    F = hidden_dim * N                 # regular-repr feature width = 128
    chw = int(np.prod(obs_shape))      # 1024
    block = -(-2 * hidden_dim // LANE) * LANE   # lane-aligned group block (128)
    A_pad = LANE                       # action padded to one full lane group

    key = jax.random.PRNGKey(0)
    (k_obs, k_act, k_enc, k_w1a, k_w1b, k_w1c, k_w1d, k_b1a, k_b1b,
     k_w2a, k_w2b, k_b2) = jax.random.split(key, 12)

    obs = jax.random.uniform(k_obs, (B,) + obs_shape, jnp.float32, 0.0, 255.0)
    action = jax.random.uniform(k_act, (B, action_dim), jnp.float32, -1.0, 1.0)

    # ---- synthetic deterministic parameters (see TODO at top) --------------
    # Encoder: 1/255 obs scaling folded in; bf16 for the MXU-native matmul.
    w_enc = (jax.random.normal(k_enc, (chw, F), jnp.float32) * 0.02 / 255.0
             ).astype(jnp.bfloat16)
    b_enc = jnp.zeros((1, F), jnp.float32)

    # Fused Q1/Q2 first 1x1 conv, split into the feature part (F rows) and the
    # action part (A_pad rows).  Columns are n_group blocks of `block` lanes:
    #   [Q1 fields (hidden) | Q2 fields (hidden) | zero pad to 128].
    def build_w1(rows, kq1, kq2, scale):
        q1 = jax.random.normal(kq1, (rows, N, hidden_dim), jnp.float32) * scale
        q2 = jax.random.normal(kq2, (rows, N, hidden_dim), jnp.float32) * scale
        blocks = []
        for j in range(N):
            blk = jnp.concatenate(
                [q1[:, j, :], q2[:, j, :],
                 jnp.zeros((rows, block - 2 * hidden_dim), jnp.float32)], axis=1)
            blocks.append(blk)
        return jnp.concatenate(blocks, axis=1)                   # (rows, N*block)

    w1f = build_w1(F, k_w1a, k_w1b, 0.05)                        # (F, N*block)
    w1a_body = build_w1(action_dim, k_w1c, k_w1d, 0.05)          # (A, N*block)
    w1a = jnp.zeros((A_pad, N * block), jnp.float32).at[:action_dim, :].set(w1a_body)
    # Bias constant across the N group channels of a field (equivariance constraint).
    b1_block = jnp.concatenate(
        [jax.random.normal(k_b1a, (hidden_dim,), jnp.float32) * 0.01,
         jax.random.normal(k_b1b, (hidden_dim,), jnp.float32) * 0.01,
         jnp.zeros((block - 2 * hidden_dim,), jnp.float32)])
    b1 = jnp.tile(b1_block, (N,))[None, :]                       # (1, N*block)

    # Fused Q1/Q2 final 1x1 conv -> lane-dense (., 128) slab, col0=q1, col1=q2.
    w2 = jnp.zeros((block, OUT_LANES), jnp.float32)
    w2 = w2.at[:hidden_dim, 0].set(
        jax.random.normal(k_w2a, (hidden_dim,), jnp.float32) * 0.1)
    w2 = w2.at[hidden_dim:2 * hidden_dim, 1].set(
        jax.random.normal(k_w2b, (hidden_dim,), jnp.float32) * 0.1)
    b2 = jnp.zeros((1, OUT_LANES), jnp.float32).at[0, 0:2].set(
        jax.random.normal(k_b2, (2,), jnp.float32) * 0.01)

    params = (w_enc, b_enc, w1f, w1a, b1, w2, b2)

    q1, q2 = jax.block_until_ready(critic_forward(obs, action, params))
    r1, r2 = critic_reference(obs, action, params)

    assert q1.shape == (B, 1) and q2.shape == (B, 1)
    assert bool(jnp.all(jnp.isfinite(q1))) and bool(jnp.all(jnp.isfinite(q2)))
    np.testing.assert_allclose(np.asarray(q1), np.asarray(r1), rtol=1e-3, atol=1e-3)
    np.testing.assert_allclose(np.asarray(q2), np.asarray(r2), rtol=1e-3, atol=1e-3)
    print("KERNEL_OK")
</pallas_src>

<mosaic_0001>
module attributes {stable_mosaic.version = 11 : i64} {
  func.func @_critic_kernel(%arg0: memref<16x1024xf32, #tpu.memory_space<vmem>>, %arg1: memref<16x128xf32, #tpu.memory_space<vmem>>, %arg2: memref<1024x128xbf16, #tpu.memory_space<vmem>>, %arg3: memref<1x128xf32, #tpu.memory_space<vmem>>, %arg4: memref<128x512xf32, #tpu.memory_space<vmem>>, %arg5: memref<128x512xf32, #tpu.memory_space<vmem>>, %arg6: memref<1x512xf32, #tpu.memory_space<vmem>>, %arg7: memref<128x128xf32, #tpu.memory_space<vmem>>, %arg8: memref<1x128xf32, #tpu.memory_space<vmem>>, %arg9: memref<16x128xf32, #tpu.memory_space<vmem>>) attributes {dimension_semantics = [], scalar_prefetch = 0 : i64, scratch_operands = 0 : i64, tpu.core_type = #tpu.core_type<tc>} {
    %c0 = arith.constant 0 : index
    %c0_0 = arith.constant 0 : index
    %0 = vector.load %arg0[%c0, %c0_0] : memref<16x1024xf32, #tpu.memory_space<vmem>>, vector<16x1024xf32>
    %1 = arith.truncf %0 : vector<16x1024xf32> to vector<16x1024xbf16>
    %c0_1 = arith.constant 0 : index
    %c0_2 = arith.constant 0 : index
    %2 = vector.load %arg2[%c0_1, %c0_2] : memref<1024x128xbf16, #tpu.memory_space<vmem>>, vector<1024x128xbf16>
    %cst = arith.constant dense<0.000000e+00> : vector<16x128xf32>
    %3 = tpu.matmul %1, %2, %cst {dimension_numbers = #tpu.dot_dimension_numbers<[1], [0], [0], [1], [0, 0, 1, 1], [], []>} : vector<16x1024xbf16>, vector<1024x128xbf16>, vector<16x128xf32> -> vector<16x128xf32>
    %c0_3 = arith.constant 0 : index
    %c0_4 = arith.constant 0 : index
    %4 = vector.load %arg3[%c0_3, %c0_4] : memref<1x128xf32, #tpu.memory_space<vmem>>, vector<1x128xf32>
    %5 = vector.broadcast %4 : vector<1x128xf32> to vector<16x128xf32>
    %6 = arith.addf %3, %5 : vector<16x128xf32>
    %cst_5 = arith.constant 0.000000e+00 : f32
    %7 = vector.broadcast %cst_5 : f32 to vector<16x128xf32>
    %8 = arith.maximumf %6, %7 : vector<16x128xf32>
    %c0_6 = arith.constant 0 : index
    %c0_7 = arith.constant 0 : index
    %9 = vector.load %arg4[%c0_6, %c0_7] : memref<128x512xf32, #tpu.memory_space<vmem>>, vector<128x512xf32>
    %cst_8 = arith.constant dense<0.000000e+00> : vector<16x512xf32>
    %10 = tpu.matmul %8, %9, %cst_8 {dimension_numbers = #tpu.dot_dimension_numbers<[1], [0], [0], [1], [0, 0, 1, 1], [], []>} : vector<16x128xf32>, vector<128x512xf32>, vector<16x512xf32> -> vector<16x512xf32>
    %c0_9 = arith.constant 0 : index
    %c0_10 = arith.constant 0 : index
    %11 = vector.load %arg1[%c0_9, %c0_10] : memref<16x128xf32, #tpu.memory_space<vmem>>, vector<16x128xf32>
    %c0_11 = arith.constant 0 : index
    %c0_12 = arith.constant 0 : index
    %12 = vector.load %arg5[%c0_11, %c0_12] : memref<128x512xf32, #tpu.memory_space<vmem>>, vector<128x512xf32>
    %cst_13 = arith.constant dense<0.000000e+00> : vector<16x512xf32>
    %13 = tpu.matmul %11, %12, %cst_13 {dimension_numbers = #tpu.dot_dimension_numbers<[1], [0], [0], [1], [0, 0, 1, 1], [], []>} : vector<16x128xf32>, vector<128x512xf32>, vector<16x512xf32> -> vector<16x512xf32>
    %14 = arith.addf %10, %13 : vector<16x512xf32>
    %c0_14 = arith.constant 0 : index
    %c0_15 = arith.constant 0 : index
    %15 = vector.load %arg6[%c0_14, %c0_15] : memref<1x512xf32, #tpu.memory_space<vmem>>, vector<1x512xf32>
    %16 = vector.broadcast %15 : vector<1x512xf32> to vector<16x512xf32>
    %17 = arith.addf %14, %16 : vector<16x512xf32>
    %cst_16 = arith.constant 0.000000e+00 : f32
    %18 = vector.broadcast %cst_16 : f32 to vector<16x512xf32>
    %19 = arith.maximumf %17, %18 : vector<16x512xf32>
    %20 = vector.extract_strided_slice %19 {offsets = [0, 0], sizes = [16, 128], strides = [1, 1]} : vector<16x512xf32> to vector<16x128xf32>
    %21 = vector.extract_strided_slice %19 {offsets = [0, 128], sizes = [16, 128], strides = [1, 1]} : vector<16x512xf32> to vector<16x128xf32>
    %22 = arith.maximumf %20, %21 : vector<16x128xf32>
    %23 = vector.extract_strided_slice %19 {offsets = [0, 256], sizes = [16, 128], strides = [1, 1]} : vector<16x512xf32> to vector<16x128xf32>
    %24 = arith.maximumf %22, %23 : vector<16x128xf32>
    %25 = vector.extract_strided_slice %19 {offsets = [0, 384], sizes = [16, 128], strides = [1, 1]} : vector<16x512xf32> to vector<16x128xf32>
    %26 = arith.maximumf %24, %25 : vector<16x128xf32>
    %c0_17 = arith.constant 0 : index
    %c0_18 = arith.constant 0 : index
    %27 = vector.load %arg7[%c0_17, %c0_18] : memref<128x128xf32, #tpu.memory_space<vmem>>, vector<128x128xf32>
    %cst_19 = arith.constant dense<0.000000e+00> : vector<16x128xf32>
    %28 = tpu.matmul %26, %27, %cst_19 {dimension_numbers = #tpu.dot_dimension_numbers<[1], [0], [0], [1], [0, 0, 1, 1], [], []>} : vector<16x128xf32>, vector<128x128xf32>, vector<16x128xf32> -> vector<16x128xf32>
    %c0_20 = arith.constant 0 : index
    %c0_21 = arith.constant 0 : index
    %29 = vector.load %arg8[%c0_20, %c0_21] : memref<1x128xf32, #tpu.memory_space<vmem>>, vector<1x128xf32>
    %30 = vector.broadcast %29 : vector<1x128xf32> to vector<16x128xf32>
    %31 = arith.addf %28, %30 : vector<16x128xf32>
    %c0_22 = arith.constant 0 : index
    %c0_23 = arith.constant 0 : index
    %32 = vector.load %arg9[%c0_22, %c0_23] : memref<16x128xf32, #tpu.memory_space<vmem>>, vector<16x128xf32>
    tpu.vector_store %arg9[%c0_22, %c0_23], %31 {strides = array<i32>} : memref<16x128xf32, #tpu.memory_space<vmem>>, vector<16x128xf32>,
    return
  }
}

</mosaic_0001>

<bundles_post_ra>
// kernel: tpu_custom_call.1
= control target key start
LH: loop header
LB: loop body
LE: loop exit
PB: predicated region body
PF: predicated region fallthrough
CT: control target
= control target key end

     0   :  { %14 = vsyncpa [#allocation3], 0  ;;  %s1981_s0 = inlined_call_operand.hbm [shape: f32[16,1024], index: 0, kind: input, shape index: {}]   ;;  %s1982_s1 = inlined_call_operand.hbm [shape: f32[16,128], index: 1, kind: input, shape index: {}]   ;;  %s1983_s2 = inlined_call_operand.hbm [shape: bf16[1024,128], index: 2, kind: input, shape index: {}]   ;;  %s1984_s3 = inlined_call_operand.vmem [shape: f32[1,128], index: 3, kind: input, shape index: {}]   ;;  %s1985_s4 = inlined_call_operand.hbm [shape: f32[128,512], index: 4, kind: input, shape index: {}]   ;;  %s1986_s5 = inlined_call_operand.hbm [shape: f32[128,512], index: 5, kind: input, shape index: {}]   ;;  %s1987_s6 = inlined_call_operand.vmem [shape: f32[1,512], index: 6, kind: input, shape index: {}]   ;;  %s1988_s7 = inlined_call_operand.hbm [shape: f32[128,128], index: 7, kind: input, shape index: {}]   ;;  %s1989_s8 = inlined_call_operand.vmem [shape: f32[1,128], index: 8, kind: input, shape index: {}]   ;;  %s1990_s9 = inlined_call_operand.hbm [shape: f32[16,128], index: 9, kind: output, shape index: {}]  }
   0x1   :  { %15 = vsyncpa [#allocation6], 0 }
   0x2   :  { %16 = vsyncpa [#allocation9], 0 }
   0x3   :  { %17 = vsyncpa [#allocation12], 0 }
   0x4   :  { %18 = vsyncpa [#allocation4], 0  ;;  %s1863_s30 = smov [#allocation5]  }
   0x5   :  { %s36_s10 = sshll.u32 %s1863_s30, 4  ;;  %s37_s10 = int_to_ptr.vmem [resolvable:$true] %s36_s10 }
   0x6   :  { %s1721_s11 = scalar_lea.vmem %s37_s10, 256  ;;  %p1726_p1 = scmp.lt.s32.totalorder %s37_s10, %s37_s10 }
   0x7   :  { %p1722_p0 = scmp.ne.s32.totalorder %s37_s10, %s1721_s11  ;;  %p1727_p2 = scmp.lt.s32.totalorder %s1721_s11, %s1721_s11 }
   0x9   :  { %p1728_p3 = por %p1727_p2, %p1726_p1 }
   0xb   :  { %p1729_p4 = pnand %p1728_p3, %p1722_p0 }
   0xd   :  { %1732 = shalt.err (!%p1729_p4)
}
   0xe   :  { %s1864_s12 = smov 128   ;;  %s1865_s13 = smov 8  }
   0xf   :  { %42 = dma.hbm_to_vmem [thread:$0]  %s1982_s1, 256, %s37_s10, [#allocation6], %s1864_s12, %s1864_s12, %s1865_s13  }
  0x10   :  { %s1866_s16 = smov [#allocation8]  }
  0x11   :  { %s62_s17 = sshll.u32 %s1866_s16, 4  ;;  %s63_s17 = int_to_ptr.vmem [resolvable:$true] %s62_s17 }
  0x12   :  { %s1741_s18 = scalar_lea.vmem %s63_s17, 8192  ;;  %p1746_p6 = scmp.lt.s32.totalorder %s63_s17, %s63_s17 }
  0x13   :  { %p1742_p5 = scmp.ne.s32.totalorder %s63_s17, %s1741_s18  ;;  %p1747_p7 = scmp.lt.s32.totalorder %s1741_s18, %s1741_s18 }
  0x15   :  { %p1748_p8 = por %p1747_p7, %p1746_p6 }
  0x17   :  { %p1749_p9 = pnand %p1748_p8, %p1742_p5 }
  0x19   :  { %1752 = shalt.err (!%p1749_p9)
}
  0x1a   :  { %s1867_s19 = smov 512   ;;  %s1868_s20 = smov 32  }
  0x1b   :  { %68 = dma.hbm_to_vmem [thread:$0]  %s1985_s4, 8192, %s63_s17, [#allocation9], %s1867_s19, %s1867_s19, %s1868_s20  }
  0x1c   :  { %s1869_s1 = smov [#allocation2]  }
  0x1d   :  { %s24_s23 = sshll.u32 %s1869_s1, 4  ;;  %s25_s23 = int_to_ptr.vmem [resolvable:$true] %s24_s23 }
  0x1e   :  { %s1761_s24 = scalar_lea.vmem %s25_s23, 2048  ;;  %p1766_p11 = scmp.lt.s32.totalorder %s25_s23, %s25_s23 }
  0x1f   :  { %p1762_p10 = scmp.ne.s32.totalorder %s25_s23, %s1761_s24  ;;  %p1767_p12 = scmp.lt.s32.totalorder %s1761_s24, %s1761_s24 }
  0x21   :  { %p1768_p13 = por %p1767_p12, %p1766_p11 }
  0x23   :  { %p1769_p0 = pnand %p1768_p13, %p1762_p10 }
  0x25   :  { %1772 = shalt.err (!%p1769_p0)
}
  0x26   :  { %s1870_s25 = smov 1024   ;;  %s1871_s26 = smov 64  }
  0x27   :  { %30 = dma.hbm_to_vmem [thread:$0]  %s1981_s0, 2048, %s25_s23, [#allocation3], %s1870_s25, %s1870_s25, %s1871_s26  }
  0x28   :  { %s1872_s29 = smov [#allocation7]  }
  0x29   :  { %s48_s30 = sshll.u32 %s1872_s29, 4  ;;  %s49_s30 = int_to_ptr.vmem [resolvable:$true] %s48_s30 }
  0x2a   :  { %s1781_s4 = scalar_lea.vmem %s49_s30, 8192  ;;  %p1786_p2 = scmp.lt.s32.totalorder %s49_s30, %s49_s30 }
  0x2b   :  { %p1782_p1 = scmp.ne.s32.totalorder %s49_s30, %s1781_s4  ;;  %p1787_p3 = scmp.lt.s32.totalorder %s1781_s4, %s1781_s4 }
  0x2d   :  { %p1788_p4 = por %p1787_p3, %p1786_p2 }
  0x2f   :  { %p1789_p5 = pnand %p1788_p4, %p1782_p1 }
  0x31   :  { %1792 = shalt.err (!%p1789_p5)
}
  0x32   :  { %s1873_s10 = smov 4   ;;  %s1874_s15 = smov [#allocation10]  }
  0x33   :  { %54 = dma.hbm_to_vmem [thread:$0]  %s1983_s2, 8192, %s49_s30, [#allocation6], %s1871_s26, %s1871_s26, %s1873_s10  }
  0x34   :  { %s74_s16 = sshll.u32 %s1874_s15, 4  ;;  %s1875_s17 = smov [#allocation11]   ;;  %s75_s16 = int_to_ptr.vmem [resolvable:$true] %s74_s16 }
  0x35   :  { %s88_s0 = sshll.u32 %s1875_s17, 4  ;;  %s1801_s18 = scalar_lea.vmem %s75_s16, 8192  ;;  %s89_s0 = int_to_ptr.vmem [resolvable:$true] %s88_s0 }
  0x36   :  { %p1802_p6 = scmp.ne.s32.totalorder %s75_s16, %s1801_s18  ;;  %p1806_p7 = scmp.lt.s32.totalorder %s75_s16, %s75_s16 }
  0x37   :  { %p1807_p8 = scmp.lt.s32.totalorder %s1801_s18, %s1801_s18 }
  0x39   :  { %p1808_p9 = por %p1807_p8, %p1806_p7 }
  0x3b   :  { %p1809_p10 = pnand %p1808_p9, %p1802_p6 }
  0x3d   :  { %1812 = shalt.err (!%p1809_p10)
}
  0x3e   :  { %80 = dma.hbm_to_vmem [thread:$0]  %s1986_s5, 8192, %s75_s16, [#allocation9], %s1867_s19, %s1867_s19, %s1868_s20  }
  0x3f   :  { %s1821_s2 = scalar_lea.vmem %s89_s0, 2048  ;;  %p1826_p12 = scmp.lt.s32.totalorder %s89_s0, %s89_s0 }
  0x40   :  { %p1822_p11 = scmp.ne.s32.totalorder %s89_s0, %s1821_s2  ;;  %p1827_p13 = scmp.lt.s32.totalorder %s1821_s2, %s1821_s2 }
  0x42   :  { %p1828_p0 = por %p1827_p13, %p1826_p12 }
  0x44   :  { %p1829_p1 = pnand %p1828_p0, %p1822_p11 }
  0x46   :  { %1832 = shalt.err (!%p1829_p1)
}
  0x47   :  { %94 = dma.hbm_to_vmem [thread:$0]  %s1988_s7, 2048, %s89_s0, [#allocation12], %s1864_s12, %s1864_s12, %s1865_s13  }
  0x48   :  { %1853 = dma.done.wait [#allocation3], 2048  }
  0x49   :  { %1854 = vsyncadd [#allocation3], 4294965248 }
  0x4a   :  { %1855 = dma.done.wait [#allocation6], 8448  }
  0x4b   :  { %1856 = vsyncadd [#allocation6], 4294958848 }
  0x4c   :  { %1857 = dma.done.wait [#allocation9], 16384  }
  0x4d   :  { %1858 = vsyncadd [#allocation9], 4294950912 }
  0x4e   :  { %1859 = dma.done.wait [#allocation12], 2048  }
  0x4f   :  { %1860 = vsyncadd [#allocation12], 4294965248  ;;  %v1649_v0 = vld [vmem:[#allocation7 + $0x78] sm:$0xff]   ;;  %v1653_v4 = vld [vmem:[#allocation7 + $0x70] sm:$0xff]   ;;  %s1877_s24 = smov [#allocation13]  }
  0x50   :  { %v1650_v1 = vld [vmem:[#allocation7 + $0xf8] sm:$0xff]   ;;  %1493 = vmatprep.subr.bf16.mxu0 %v1649_v0  ;;  %v1654_v5 = vld [vmem:[#allocation7 + $0xf0] sm:$0xff]   ;;  %v1657_v8 = vld [vmem:[#allocation7 + $0x68] sm:$0xff]   ;;  %s1412_s25 = sshll.u32 %s1877_s24, 4  ;;  %s1413_s25 = int_to_ptr.vmem [resolvable:$true] %s1412_s25 }
  0x51   :  { %v1651_v2 = vld [vmem:[#allocation7 + $0x38] sm:$0xff]   ;;  %1515 = vmatprep.subr.bf16.mxu1 %v1650_v1  ;;  %v1655_v6 = vld [vmem:[#allocation7 + $0x30] sm:$0xff]   ;;  %v1658_v9 = vld [vmem:[#allocation7 + $0xe8] sm:$0xff]   ;;  %s1833_s26 = scalar_lea.vmem %s1413_s25, 256  ;;  %p1838_p3 = scmp.lt.s32.totalorder %s1413_s25, %s1413_s25 }
  0x52   :  { %v1652_v3 = vld [vmem:[#allocation7 + $0xb8] sm:$0xff]   ;;  %1494 = vmatpush3.bf16.msra.mxu0 %v1651_v2  ;;  %v1656_v7 = vld [vmem:[#allocation7 + $0xb0] sm:$0xff]   ;;  %v1659_v10 = vld [vmem:[#allocation7 + $0x28] sm:$0xff]   ;;  %p1834_p2 = scmp.ne.s32.totalorder %s1413_s25, %s1833_s26  ;;  %p1839_p4 = scmp.lt.s32.totalorder %s1833_s26, %s1833_s26 }
  0x53   :  { %1516 = vmatpush3.bf16.msra.mxu1 %v1652_v3  ;;  %1495 = vmatprep.subr.bf16.mxu0 %v1653_v4  ;;  %v1660_v11 = vld [vmem:[#allocation7 + $0xa8] sm:$0xff]   ;;  %v1661_v12 = vld [vmem:[#allocation7 + $0x60] sm:$0xff]   ;;  %v1665_v16 = vld [vmem:[#allocation7 + $0x58] sm:$0xff]  }
  0x54   :  { %1517 = vmatprep.subr.bf16.mxu1 %v1654_v5  ;;  %v1662_v13 = vld [vmem:[#allocation7 + $0xe0] sm:$0xff]   ;;  %v1666_v17 = vld [vmem:[#allocation7 + $0xd8] sm:$0xff]   ;;  %v1669_v20 = vld [vmem:[#allocation7 + $0x50] sm:$0xff]   ;;  %p1840_p5 = por %p1839_p4, %p1838_p3 }
  0x55   :  { %v1663_v14 = vld [vmem:[#allocation7 + $0x20] sm:$0xff]   ;;  %v1667_v18 = vld [vmem:[#allocation7 + $0x18] sm:$0xff]   ;;  %v1670_v21 = vld [vmem:[#allocation7 + $0xd0] sm:$0xff]  }
  0x56   :  { %1496 = vmatpush3.bf16.msra.mxu0 %v1655_v6  ;;  %v1664_v15 = vld [vmem:[#allocation7 + $0xa0] sm:$0xff]   ;;  %v1668_v19 = vld [vmem:[#allocation7 + $0x98] sm:$0xff]   ;;  %v1671_v22 = vld [vmem:[#allocation7 + $0x10] sm:$0xff]   ;;  %p1841_p6 = pnand %p1840_p5, %p1834_p2 }
  0x57   :  { %1518 = vmatpush3.bf16.msra.mxu1 %v1656_v7  ;;  %1497 = vmatprep.subr.bf16.mxu0 %v1657_v8  ;;  %v1672_v23 = vld [vmem:[#allocation7 + $0x90] sm:$0xff]   ;;  %v1673_v24 = vld [vmem:[#allocation7 + $0x48] sm:$0xff]   ;;  %v1677_v28 = vld [vmem:[#allocation7 + $0x40] sm:$0xff]  }
  0x58   :  { %1519 = vmatprep.subr.bf16.mxu1 %v1658_v9  ;;  %v1674_v25 = vld [vmem:[#allocation7 + $0xc8] sm:$0xff]   ;;  %v1678_v29 = vld [vmem:[#allocation7 + $0xc0] sm:$0xff]   ;;  %v117_v32 = vld [vmem:[#allocation2 + $0x8] sm:$0xff] }
  0x59   :  { %v1675_v26 = vld [vmem:[#allocation7 + $0x8] sm:$0xff]   ;;  %v1679_v30 = vld [vmem:[#allocation7] sm:$0xff]   ;;  %v125_v33 = vld [vmem:[#allocation2 + $0x48] sm:$0xff] }
  0x5a   :  { %1498 = vmatpush3.bf16.msra.mxu0 %v1659_v10  ;;  %v1676_v27 = vld [vmem:[#allocation7 + $0x88] sm:$0xff]   ;;  %v1680_v31 = vld [vmem:[#allocation7 + $0x80] sm:$0xff]   ;;  %v133_v35 = vpack.c.bf16 %v125_v33, %v117_v32  ;;  %v116_v37 = vld [vmem:[#allocation2] sm:$0xff] }
  0x5b   :  { %1520 = vmatpush3.bf16.msra.mxu1 %v1660_v11  ;;  %1499 = vmatprep.subr.bf16.mxu0 %v1661_v12  ;;  %v119_v34 = vld [vmem:[#allocation2 + $0x18] sm:$0xff]  ;;  %v124_v38 = vld [vmem:[#allocation2 + $0x40] sm:$0xff]  ;;  %v118_v41 = vld [vmem:[#allocation2 + $0x10] sm:$0xff] }
  0x5c   :  { %1521 = vmatprep.subr.bf16.mxu1 %v1662_v13  ;;  %v127_v36 = vld [vmem:[#allocation2 + $0x58] sm:$0xff]  ;;  %v132_v40 = vpack.c.bf16 %v124_v38, %v116_v37  ;;  %v126_v42 = vld [vmem:[#allocation2 + $0x50] sm:$0xff]  ;;  %691 = vmatprep.mubr.bf16.mxu0 %v133_v35  ;;  %v1681_v44 = vld [vmem:[#allocation7 + $0x178] sm:$0xff]  }
  0x5d   :  { %v135_v39 = vpack.c.bf16 %v127_v36, %v119_v34  ;;  %v134_v43 = vpack.c.bf16 %v126_v42, %v118_v41  ;;  %v1682_v45 = vld [vmem:[#allocation7 + $0x1f8] sm:$0xff]   ;;  %v1685_v48 = vld [vmem:[#allocation7 + $0x170] sm:$0xff]   ;;  %v1689_v52 = vld [vmem:[#allocation7 + $0x168] sm:$0xff]  }
  0x5e   :  { %1500 = vmatpush3.bf16.msra.mxu0 %v1663_v14  ;;  %v1683_v46 = vld [vmem:[#allocation7 + $0x138] sm:$0xff]   ;;  %v1686_v49 = vld [vmem:[#allocation7 + $0x1f0] sm:$0xff]   ;;  %v1690_v53 = vld [vmem:[#allocation7 + $0x1e8] sm:$0xff]  }
  0x5f   :  { %1522 = vmatpush3.bf16.msra.mxu1 %v1664_v15  ;;  %1501 = vmatprep.subr.bf16.mxu0 %v1665_v16  ;;  %v1684_v47 = vld [vmem:[#allocation7 + $0x1b8] sm:$0xff]   ;;  %v1687_v50 = vld [vmem:[#allocation7 + $0x130] sm:$0xff]   ;;  %v1691_v54 = vld [vmem:[#allocation7 + $0x128] sm:$0xff]  }
  0x60   :  { %1523 = vmatprep.subr.bf16.mxu1 %v1666_v17  ;;  %732 = vmatprep.mubr.bf16.mxu1 %v135_v39  ;;  %v1688_v51 = vld [vmem:[#allocation7 + $0x1b0] sm:$0xff]   ;;  %v1692_v55 = vld [vmem:[#allocation7 + $0x1a8] sm:$0xff]   ;;  %v1693_v56 = vld [vmem:[#allocation7 + $0x160] sm:$0xff]  }
  0x61   :  { %v1694_v57 = vld [vmem:[#allocation7 + $0x1e0] sm:$0xff]   ;;  %v1697_v60 = vld [vmem:[#allocation7 + $0x158] sm:$0xff]   ;;  %v1701_v0 = vld [vmem:[#allocation7 + $0x150] sm:$0xff]  }
  0x62   :  { %1502 = vmatpush3.bf16.msra.mxu0 %v1667_v18  ;;  %v1695_v58 = vld [vmem:[#allocation7 + $0x120] sm:$0xff]   ;;  %v1698_v61 = vld [vmem:[#allocation7 + $0x1d8] sm:$0xff]   ;;  %v1702_v1 = vld [vmem:[#allocation7 + $0x1d0] sm:$0xff]  }
  0x63   :  { %1524 = vmatpush3.bf16.msra.mxu1 %v1668_v19  ;;  %1503 = vmatprep.subr.bf16.mxu0 %v1669_v20  ;;  %v1696_v59 = vld [vmem:[#allocation7 + $0x1a0] sm:$0xff]   ;;  %v1699_v62 = vld [vmem:[#allocation7 + $0x118] sm:$0xff]   ;;  %v1703_v2 = vld [vmem:[#allocation7 + $0x110] sm:$0xff]  }
  0x64   :  { %1525 = vmatprep.subr.bf16.mxu1 %v1670_v21  ;;  %v1700_v63 = vld [vmem:[#allocation7 + $0x198] sm:$0xff]   ;;  %v1704_v3 = vld [vmem:[#allocation7 + $0x190] sm:$0xff]   ;;  %v1705_v4 = vld [vmem:[#allocation7 + $0x148] sm:$0xff]  }
  0x65   :  { %v1706_v5 = vld [vmem:[#allocation7 + $0x1c8] sm:$0xff]   ;;  %v1709_v8 = vld [vmem:[#allocation7 + $0x140] sm:$0xff]   ;;  %v121_v12 = vld [vmem:[#allocation2 + $0x28] sm:$0xff] }
  0x66   :  { %1504 = vmatpush3.bf16.msra.mxu0 %v1671_v22  ;;  %v1707_v6 = vld [vmem:[#allocation7 + $0x108] sm:$0xff]   ;;  %v1710_v9 = vld [vmem:[#allocation7 + $0x1c0] sm:$0xff]   ;;  %v129_v13 = vld [vmem:[#allocation2 + $0x68] sm:$0xff] }
  0x67   :  { %1526 = vmatpush3.bf16.msra.mxu1 %v1672_v23  ;;  %1505 = vmatprep.subr.bf16.mxu0 %v1673_v24  ;;  %v1708_v7 = vld [vmem:[#allocation7 + $0x188] sm:$0xff]   ;;  %v1711_v10 = vld [vmem:[#allocation7 + $0x100] sm:$0xff]   ;;  %v137_v16 = vpack.c.bf16 %v129_v13, %v121_v12  ;;  %v120_v18 = vld [vmem:[#allocation2 + $0x20] sm:$0xff] }
  0x68   :  { %1527 = vmatprep.subr.bf16.mxu1 %v1674_v25  ;;  %v1712_v11 = vld [vmem:[#allocation7 + $0x180] sm:$0xff]   ;;  %v123_v14 = vld [vmem:[#allocation2 + $0x38] sm:$0xff]  ;;  %v128_v19 = vld [vmem:[#allocation2 + $0x60] sm:$0xff] }
  0x69   :  { %v131_v15 = vld [vmem:[#allocation2 + $0x78] sm:$0xff]  ;;  %v122_v20 = vld [vmem:[#allocation2 + $0x30] sm:$0xff]  ;;  %v136_v21 = vpack.c.bf16 %v128_v19, %v120_v18  ;;  %v949_v32 = vld [vmem:[#allocation10 + $0x1d0] sm:$0xff] }
  0x6a   :  { %1506 = vmatpush3.bf16.msra.mxu0 %v1675_v26  ;;  %v139_v17 = vpack.c.bf16 %v131_v15, %v123_v14  ;;  %v130_v22 = vld [vmem:[#allocation2 + $0x70] sm:$0xff]  ;;  %v952_v23 = vld [vmem:[#allocation10 + $0x1e8] sm:$0xff]  ;;  %v954_v26 = vld [vmem:[#allocation10 + $0x1f8] sm:$0xff] }
  0x6b   :  { %1528 = vmatpush3.bf16.msra.mxu1 %v1676_v27  ;;  %1507 = vmatprep.subr.bf16.mxu0 %v1677_v28  ;;  %v951_v24 = vld [vmem:[#allocation10 + $0x1e0] sm:$0xff]  ;;  %v138_v25 = vpack.c.bf16 %v130_v22, %v122_v20  ;;  %v948_v27 = vld [vmem:[#allocation10 + $0x1c8] sm:$0xff]  ;;  %v953_v28 = vld [vmem:[#allocation10 + $0x1f0] sm:$0xff] }
  0x6c   :  { %1529 = vmatprep.subr.bf16.mxu1 %v1678_v29  ;;  %v947_v29 = vld [vmem:[#allocation10 + $0x1c0] sm:$0xff]  ;;  %v946_v34 = vld [vmem:[#allocation10 + $0x1b8] sm:$0xff]  ;;  %v940_v35 = vld [vmem:[#allocation10 + $0x188] sm:$0xff] }
  0x6d   :  { %v943_v33 = vld [vmem:[#allocation10 + $0x1a0] sm:$0xff]  ;;  %v945_v36 = vld [vmem:[#allocation10 + $0x1b0] sm:$0xff]  ;;  %v942_v38 = vld [vmem:[#allocation10 + $0x198] sm:$0xff] }
  0x6e   :  { %1508 = vmatpush3.bf16.msra.mxu0 %v1679_v30  ;;  %v950_v30 = vld [vmem:[#allocation10 + $0x1d8] sm:$0xff]  ;;  %v939_v37 = vld [vmem:[#allocation10 + $0x180] sm:$0xff]  ;;  %v936_v39 = vld [vmem:[#allocation10 + $0x168] sm:$0xff] }
  0x6f   :  { %1530 = vmatpush3.bf16.msra.mxu1 %v1680_v31  ;;  %1537 = vmatprep.subr.bf16.mxu0 %v1681_v44  ;;  %v944_v31 = vld [vmem:[#allocation10 + $0x1a8] sm:$0xff]  ;;  %v935_v41 = vld [vmem:[#allocation10 + $0x160] sm:$0xff]  ;;  %v938_v42 = vld [vmem:[#allocation10 + $0x178] sm:$0xff] }
  0x70   :  { %1559 = vmatprep.subr.bf16.mxu1 %v1682_v45  ;;  %v937_v44 = vld [vmem:[#allocation10 + $0x170] sm:$0xff]  ;;  %v931_v45 = vld [vmem:[#allocation10 + $0x140] sm:$0xff]  ;;  %v902_v14 = vld [vmem:[#allocation10 + $0x58] sm:$0xff] }
  0x71   :  { %692 = vmatmul.mubr.bf16.vlgmr.msra.gmra.mxu0 %v132_v40  ;;  %v941_v40 = vld [vmem:[#allocation10 + $0x190] sm:$0xff]  ;;  %v899_v13 = vld [vmem:[#allocation10 + $0x40] sm:$0xff]  ;;  %v896_v15 = vld [vmem:[#allocation10 + $0x28] sm:$0xff] }
  0x72   :  { %733 = vmatmul.mubr.bf16.vlgmr.msra.gmra.mxu1 %v134_v43  ;;  %1538 = vmatpush3.bf16.msra.mxu0 %v1683_v46  ;;  %v932_v43 = vld [vmem:[#allocation10 + $0x148] sm:$0xff]  ;;  %v934_v46 = vld [vmem:[#allocation10 + $0x158] sm:$0xff]  ;;  %v905_v12 = vld [vmem:[#allocation10 + $0x70] sm:$0xff] }
  0x73   :  { %1560 = vmatpush3.bf16.msra.mxu1 %v1684_v47  ;;  %1539 = vmatprep.subr.bf16.mxu0 %v1685_v48  ;;  %v928_v47 = vld [vmem:[#allocation10 + $0x128] sm:$0xff]  ;;  %v933_v48 = vld [vmem:[#allocation10 + $0x150] sm:$0xff]  ;;  %v898_v18 = vld [vmem:[#allocation10 + $0x38] sm:$0xff] }
  0x74   :  { %1561 = vmatprep.subr.bf16.mxu1 %v1686_v49  ;;  %773 = vmatprep.mubr.bf16.mxu0 %v137_v16  ;;  %v927_v49 = vld [vmem:[#allocation10 + $0x120] sm:$0xff]  ;;  %v901_v16 = vld [vmem:[#allocation10 + $0x50] sm:$0xff]  ;;  %v892_v19 = vld [vmem:[#allocation10 + $0x8] sm:$0xff] }
  0x75   :  { %814 = vmatprep.mubr.bf16.mxu1 %v139_v17  ;;  %v895_v17 = vld [vmem:[#allocation10 + $0x20] sm:$0xff]  ;;  %v897_v20 = vld [vmem:[#allocation10 + $0x30] sm:$0xff]  ;;  %v894_v22 = vld [vmem:[#allocation10 + $0x18] sm:$0xff] }
  0x76   :  { %1540 = vmatpush3.bf16.msra.mxu0 %v1687_v50  ;;  %v930_v50 = vld [vmem:[#allocation10 + $0x138] sm:$0xff] }
  0x77   :  { %1562 = vmatpush3.bf16.msra.mxu1 %v1688_v51  ;;  %1541 = vmatprep.subr.bf16.mxu0 %v1689_v52  ;;  %v924_v51 = vld [vmem:[#allocation10 + $0x108] sm:$0xff]  ;;  %v929_v52 = vld [vmem:[#allocation10 + $0x130] sm:$0xff] }
  0x78   :  { %1563 = vmatprep.subr.bf16.mxu1 %v1690_v53  ;;  %v923_v53 = vld [vmem:[#allocation10 + $0x100] sm:$0xff] }
  0x7a   :  { %1542 = vmatpush3.bf16.msra.mxu0 %v1691_v54  ;;  %v926_v54 = vld [vmem:[#allocation10 + $0x118] sm:$0xff] }
  0x7b   :  { %1564 = vmatpush3.bf16.msra.mxu1 %v1692_v55  ;;  %1543 = vmatprep.subr.bf16.mxu0 %v1693_v56  ;;  %v920_v55 = vld [vmem:[#allocation10 + $0xe8] sm:$0xff]  ;;  %v925_v56 = vld [vmem:[#allocation10 + $0x110] sm:$0xff] }
  0x7c   :  { %1565 = vmatprep.subr.bf16.mxu1 %v1694_v57  ;;  %v919_v57 = vld [vmem:[#allocation10 + $0xe0] sm:$0xff] }
  0x7e   :  { %1544 = vmatpush3.bf16.msra.mxu0 %v1695_v58  ;;  %v922_v58 = vld [vmem:[#allocation10 + $0xf8] sm:$0xff] }
  0x7f   :  { %1566 = vmatpush3.bf16.msra.mxu1 %v1696_v59  ;;  %1545 = vmatprep.subr.bf16.mxu0 %v1697_v60  ;;  %v916_v59 = vld [vmem:[#allocation10 + $0xc8] sm:$0xff]  ;;  %v921_v60 = vld [vmem:[#allocation10 + $0xf0] sm:$0xff] }
  0x80   :  { %1567 = vmatprep.subr.bf16.mxu1 %v1698_v61  ;;  %v915_v61 = vld [vmem:[#allocation10 + $0xc0] sm:$0xff] }
  0x82   :  { %1546 = vmatpush3.bf16.msra.mxu0 %v1699_v62  ;;  %v918_v62 = vld [vmem:[#allocation10 + $0xd8] sm:$0xff] }
  0x83   :  { %1568 = vmatpush3.bf16.msra.mxu1 %v1700_v63  ;;  %1547 = vmatprep.subr.bf16.mxu0 %v1701_v0  ;;  %v912_v63 = vld [vmem:[#allocation10 + $0xa8] sm:$0xff]  ;;  %v917_v0 = vld [vmem:[#allocation10 + $0xd0] sm:$0xff] }
  0x84   :  { %1569 = vmatprep.subr.bf16.mxu1 %v1702_v1  ;;  %v911_v1 = vld [vmem:[#allocation10 + $0xa0] sm:$0xff] }
  0x86   :  { %1548 = vmatpush3.bf16.msra.mxu0 %v1703_v2  ;;  %v914_v2 = vld [vmem:[#allocation10 + $0xb8] sm:$0xff] }
  0x87   :  { %1570 = vmatpush3.bf16.msra.mxu1 %v1704_v3  ;;  %1549 = vmatprep.subr.bf16.mxu0 %v1705_v4  ;;  %v908_v3 = vld [vmem:[#allocation10 + $0x88] sm:$0xff]  ;;  %v913_v4 = vld [vmem:[#allocation10 + $0xb0] sm:$0xff] }
  0x88   :  { %1571 = vmatprep.subr.bf16.mxu1 %v1706_v5  ;;  %v907_v5 = vld [vmem:[#allocation10 + $0x80] sm:$0xff] }
  0x8a   :  { %1550 = vmatpush3.bf16.msra.mxu0 %v1707_v6  ;;  %v910_v6 = vld [vmem:[#allocation10 + $0x98] sm:$0xff] }
  0x8b   :  { %1572 = vmatpush3.bf16.msra.mxu1 %v1708_v7  ;;  %1551 = vmatprep.subr.bf16.mxu0 %v1709_v8  ;;  %v904_v7 = vld [vmem:[#allocation10 + $0x68] sm:$0xff]  ;;  %v909_v8 = vld [vmem:[#allocation10 + $0x90] sm:$0xff] }
  0x8c   :  { %1573 = vmatprep.subr.bf16.mxu1 %v1710_v9  ;;  %v903_v9 = vld [vmem:[#allocation10 + $0x60] sm:$0xff] }
  0x8e   :  { %1552 = vmatpush3.bf16.msra.mxu0 %v1711_v10  ;;  %v906_v10 = vld [vmem:[#allocation10 + $0x78] sm:$0xff] }
  0x8f   :  { %1574 = vmatpush3.bf16.msra.mxu1 %v1712_v11  ;;  %955 = vmatprep.subr.mxu0 %v952_v23  ;;  %v900_v11 = vld [vmem:[#allocation10 + $0x48] sm:$0xff]  ;;  %v889_v23 = vld [vmem:[#allocation5] sm:$0xff] }
  0x90   :  { %1032 = vmatprep.subr.mxu1 %v954_v26  ;;  %v886_v26 = vld [vmem:[#allocation8 + $0x1e8] sm:$0xff] }
  0x91   :  { %774 = vmatmul.mubr.bf16.vlgmr.msra.gmra.mxu0 %v136_v21  ;;  %v891_v21 = vld [vmem:[#allocation10] sm:$0xff] }
  0x92   :  { %815 = vmatmul.mubr.bf16.vlgmr.msra.gmra.mxu1 %v138_v25  ;;  %956 = vmatpush1.msra.mxu0 %v951_v24  ;;  %v893_v24 = vld [vmem:[#allocation10 + $0x10] sm:$0xff]  ;;  %v1876_v25 = vmov 0.0  }
  0x93   :  { %957 = vmatprep.subr.mxu0 %v948_v27  ;;  %1033 = vmatpush1.msra.mxu1 %v953_v28  ;;  %v888_v27 = vld [vmem:[#allocation8 + $0x1f8] sm:$0xff]  ;;  %v885_v28 = vld [vmem:[#allocation8 + $0x1e0] sm:$0xff] }
  0x94   :  { %958 = vmatpush1.msra.mxu0 %v947_v29  ;;  %1034 = vmatprep.subr.mxu1 %v950_v30  ;;  %v887_v29 = vld [vmem:[#allocation8 + $0x1f0] sm:$0xff]  ;;  %v882_v30 = vld [vmem:[#allocation8 + $0x1c8] sm:$0xff] }
  0x95   :  { %959 = vmatprep.subr.mxu0 %v944_v31  ;;  %1035 = vmatpush1.msra.mxu1 %v949_v32  ;;  %v884_v31 = vld [vmem:[#allocation8 + $0x1d8] sm:$0xff]  ;;  %v881_v32 = vld [vmem:[#allocation8 + $0x1c0] sm:$0xff] }
  0x96   :  { %960 = vmatpush1.msra.mxu0 %v943_v33  ;;  %1036 = vmatprep.subr.mxu1 %v946_v34  ;;  %v883_v33 = vld [vmem:[#allocation8 + $0x1d0] sm:$0xff]  ;;  %v878_v34 = vld [vmem:[#allocation8 + $0x1a8] sm:$0xff] }
  0x97   :  { %961 = vmatprep.subr.mxu0 %v940_v35  ;;  %1037 = vmatpush1.msra.mxu1 %v945_v36  ;;  %v880_v35 = vld [vmem:[#allocation8 + $0x1b8] sm:$0xff]  ;;  %v877_v36 = vld [vmem:[#allocation8 + $0x1a0] sm:$0xff] }
  0x98   :  { %962 = vmatpush1.msra.mxu0 %v939_v37  ;;  %1038 = vmatprep.subr.mxu1 %v942_v38  ;;  %v879_v37 = vld [vmem:[#allocation8 + $0x1b0] sm:$0xff]  ;;  %v874_v38 = vld [vmem:[#allocation8 + $0x188] sm:$0xff] }
  0x99   :  { %963 = vmatprep.subr.mxu0 %v936_v39  ;;  %1039 = vmatpush1.msra.mxu1 %v941_v40  ;;  %v876_v39 = vld [vmem:[#allocation8 + $0x198] sm:$0xff]  ;;  %v873_v40 = vld [vmem:[#allocation8 + $0x180] sm:$0xff] }
  0x9a   :  { %964 = vmatpush1.msra.mxu0 %v935_v41  ;;  %1040 = vmatprep.subr.mxu1 %v938_v42  ;;  %v875_v41 = vld [vmem:[#allocation8 + $0x190] sm:$0xff]  ;;  %v870_v42 = vld [vmem:[#allocation8 + $0x168] sm:$0xff] }
  0x9b   :  { %965 = vmatprep.subr.mxu0 %v932_v43  ;;  %1041 = vmatpush1.msra.mxu1 %v937_v44  ;;  %v872_v43 = vld [vmem:[#allocation8 + $0x178] sm:$0xff]  ;;  %v869_v44 = vld [vmem:[#allocation8 + $0x160] sm:$0xff] }
  0x9c   :  { %966 = vmatpush1.msra.mxu0 %v931_v45  ;;  %1042 = vmatprep.subr.mxu1 %v934_v46  ;;  %v871_v45 = vld [vmem:[#allocation8 + $0x170] sm:$0xff]  ;;  %v866_v46 = vld [vmem:[#allocation8 + $0x148] sm:$0xff] }
  0x9d   :  { %967 = vmatprep.subr.mxu0 %v928_v47  ;;  %1043 = vmatpush1.msra.mxu1 %v933_v48  ;;  %v868_v47 = vld [vmem:[#allocation8 + $0x158] sm:$0xff]  ;;  %v865_v48 = vld [vmem:[#allocation8 + $0x140] sm:$0xff] }
  0x9e   :  { %968 = vmatpush1.msra.mxu0 %v927_v49  ;;  %1044 = vmatprep.subr.mxu1 %v930_v50  ;;  %v867_v49 = vld [vmem:[#allocation8 + $0x150] sm:$0xff]  ;;  %v862_v50 = vld [vmem:[#allocation8 + $0x128] sm:$0xff] }
  0x9f   :  { %969 = vmatprep.subr.mxu0 %v924_v51  ;;  %1045 = vmatpush1.msra.mxu1 %v929_v52  ;;  %v864_v51 = vld [vmem:[#allocation8 + $0x138] sm:$0xff]  ;;  %v861_v52 = vld [vmem:[#allocation8 + $0x120] sm:$0xff] }
  0xa0   :  { %970 = vmatpush1.msra.mxu0 %v923_v53  ;;  %1046 = vmatprep.subr.mxu1 %v926_v54  ;;  %v863_v53 = vld [vmem:[#allocation8 + $0x130] sm:$0xff]  ;;  %v858_v54 = vld [vmem:[#allocation8 + $0x108] sm:$0xff] }
  0xa1   :  { %971 = vmatprep.subr.mxu0 %v920_v55  ;;  %1047 = vmatpush1.msra.mxu1 %v925_v56  ;;  %v860_v55 = vld [vmem:[#allocation8 + $0x118] sm:$0xff]  ;;  %v857_v56 = vld [vmem:[#allocation8 + $0x100] sm:$0xff] }
  0xa2   :  { %972 = vmatpush1.msra.mxu0 %v919_v57  ;;  %1048 = vmatprep.subr.mxu1 %v922_v58  ;;  %v859_v57 = vld [vmem:[#allocation8 + $0x110] sm:$0xff]  ;;  %v854_v58 = vld [vmem:[#allocation8 + $0xe8] sm:$0xff] }
  0xa3   :  { %973 = vmatprep.subr.mxu0 %v916_v59  ;;  %1049 = vmatpush1.msra.mxu1 %v921_v60  ;;  %v856_v59 = vld [vmem:[#allocation8 + $0xf8] sm:$0xff]  ;;  %v853_v60 = vld [vmem:[#allocation8 + $0xe0] sm:$0xff] }
  0xa4   :  { %974 = vmatpush1.msra.mxu0 %v915_v61  ;;  %1050 = vmatprep.subr.mxu1 %v918_v62  ;;  %v855_v61 = vld [vmem:[#allocation8 + $0xf0] sm:$0xff]  ;;  %v850_v62 = vld [vmem:[#allocation8 + $0xc8] sm:$0xff] }
  0xa5   :  { %975 = vmatprep.subr.mxu0 %v912_v63  ;;  %1051 = vmatpush1.msra.mxu1 %v917_v0  ;;  %v852_v63 = vld [vmem:[#allocation8 + $0xd8] sm:$0xff]  ;;  %v849_v0 = vld [vmem:[#allocation8 + $0xc0] sm:$0xff] }
  0xa6   :  { %976 = vmatpush1.msra.mxu0 %v911_v1  ;;  %1052 = vmatprep.subr.mxu1 %v914_v2  ;;  %v851_v1 = vld [vmem:[#allocation8 + $0xd0] sm:$0xff]  ;;  %v846_v2 = vld [vmem:[#allocation8 + $0xa8] sm:$0xff] }
  0xa7   :  { %977 = vmatprep.subr.mxu0 %v908_v3  ;;  %1053 = vmatpush1.msra.mxu1 %v913_v4  ;;  %v848_v3 = vld [vmem:[#allocation8 + $0xb8] sm:$0xff]  ;;  %v845_v4 = vld [vmem:[#allocation8 + $0xa0] sm:$0xff] }
  0xa8   :  { %978 = vmatpush1.msra.mxu0 %v907_v5  ;;  %1054 = vmatprep.subr.mxu1 %v910_v6  ;;  %v847_v5 = vld [vmem:[#allocation8 + $0xb0] sm:$0xff]  ;;  %v842_v6 = vld [vmem:[#allocation8 + $0x88] sm:$0xff] }
  0xa9   :  { %979 = vmatprep.subr.mxu0 %v904_v7  ;;  %1055 = vmatpush1.msra.mxu1 %v909_v8  ;;  %v844_v7 = vld [vmem:[#allocation8 + $0x98] sm:$0xff]  ;;  %v841_v8 = vld [vmem:[#allocation8 + $0x80] sm:$0xff] }
  0xaa   :  { %980 = vmatpush1.msra.mxu0 %v903_v9  ;;  %1056 = vmatprep.subr.mxu1 %v906_v10  ;;  %v843_v9 = vld [vmem:[#allocation8 + $0x90] sm:$0xff]  ;;  %v838_v10 = vld [vmem:[#allocation8 + $0x68] sm:$0xff] }
  0xab   :  { %981 = vmatprep.subr.mxu0 %v900_v11  ;;  %1057 = vmatpush1.msra.mxu1 %v905_v12  ;;  %v840_v11 = vld [vmem:[#allocation8 + $0x78] sm:$0xff]  ;;  %v837_v12 = vld [vmem:[#allocation8 + $0x60] sm:$0xff] }
  0xac   :  { %982 = vmatpush1.msra.mxu0 %v899_v13  ;;  %1058 = vmatprep.subr.mxu1 %v902_v14  ;;  %v839_v13 = vld [vmem:[#allocation8 + $0x70] sm:$0xff]  ;;  %v890_v14 = vld [vmem:[#allocation5 + $0x8] sm:$0xff] }
  0xad   :  { %983 = vmatprep.subr.mxu0 %v896_v15  ;;  %1059 = vmatpush1.msra.mxu1 %v901_v16  ;;  %v834_v15 = vld [vmem:[#allocation8 + $0x48] sm:$0xff]  ;;  %v836_v16 = vld [vmem:[#allocation8 + $0x58] sm:$0xff] }
  0xae   :  { %984 = vmatpush1.msra.mxu0 %v895_v17  ;;  %1060 = vmatprep.subr.mxu1 %v898_v18  ;;  %v833_v17 = vld [vmem:[#allocation8 + $0x40] sm:$0xff]  ;;  %v835_v18 = vld [vmem:[#allocation8 + $0x50] sm:$0xff] }
  0xaf   :  { %985 = vmatprep.subr.mxu0 %v892_v19  ;;  %1061 = vmatpush1.msra.mxu1 %v897_v20  ;;  %v830_v19 = vld [vmem:[#allocation8 + $0x28] sm:$0xff]  ;;  %v832_v20 = vld [vmem:[#allocation8 + $0x38] sm:$0xff] }
  0xb0   :  { %986 = vmatpush1.msra.mxu0 %v891_v21  ;;  %1019 = vmatprep.mubr.f32.mxu0 %v1876_v25  ;;  %v829_v21 = vld [vmem:[#allocation8 + $0x20] sm:$0xff] }
  0xb1   :  { %1062 = vmatprep.subr.mxu1 %v894_v22  ;;  %1020 = vmatmul.mubr.f32.vlgmr.msra.gmra.mxu0 %v889_v23  ;;  %v831_v22 = vld [vmem:[#allocation8 + $0x30] sm:$0xff] }
  0xb2   :  { %1063 = vmatpush1.msra.mxu1 %v893_v24  ;;  %1096 = vmatprep.mubr.f32.mxu1 %v1876_v25  ;;  %v828_v24 = vld [vmem:[#allocation8 + $0x18] sm:$0xff] }
  0xb3   :  { %1109 = vmatprep.subr.mxu0 %v886_v26  ;;  %1186 = vmatprep.subr.mxu1 %v888_v27  ;;  %v825_v26 = vld [vmem:[#allocation8] sm:$0xff]  ;;  %v827_v27 = vld [vmem:[#allocation8 + $0x10] sm:$0xff] }
  0xb4   :  { %1097 = vmatmul.mubr.f32.vlgmr.msra.gmra.mxu1 %v889_v23  ;;  %1110 = vmatpush1.msra.mxu0 %v885_v28  ;;  %v826_v23 = vld [vmem:[#allocation8 + $0x8] sm:$0xff]  ;;  %v1322_v28 = vld [vmem:[#allocation11 + $0x78] sm:$0xff] }
  0xb5   :  { %1187 = vmatpush1.msra.mxu1 %v887_v29  ;;  %1111 = vmatprep.subr.mxu0 %v882_v30 }
  0xb6   :  { %1188 = vmatprep.subr.mxu1 %v884_v31  ;;  %1112 = vmatpush1.msra.mxu0 %v881_v32 }
  0xb7   :  { %1189 = vmatpush1.msra.mxu1 %v883_v33  ;;  %1113 = vmatprep.subr.mxu0 %v878_v34 }
  0xb8   :  { %1190 = vmatprep.subr.mxu1 %v880_v35  ;;  %1114 = vmatpush1.msra.mxu0 %v877_v36  ;;  %v1427_v36 = vld [vmem:[%s1984_s3] ss:$0 sm:$0xff] }
  0xb9   :  { %1191 = vmatpush1.msra.mxu1 %v879_v37  ;;  %1115 = vmatprep.subr.mxu0 %v874_v38 }
  0xba   :  { %1192 = vmatprep.subr.mxu1 %v876_v39  ;;  %1116 = vmatpush1.msra.mxu0 %v873_v40 }
  0xbb   :  { %1193 = vmatpush1.msra.mxu1 %v875_v41  ;;  %1117 = vmatprep.subr.mxu0 %v870_v42 }
  0xbc   :  { %1194 = vmatprep.subr.mxu1 %v872_v43  ;;  %1118 = vmatpush1.msra.mxu0 %v869_v44 }
  0xbd   :  { %1195 = vmatpush1.msra.mxu1 %v871_v45  ;;  %1119 = vmatprep.subr.mxu0 %v866_v46 }
  0xbe   :  { %1196 = vmatprep.subr.mxu1 %v868_v47  ;;  %1120 = vmatpush1.msra.mxu0 %v865_v48 }
  0xbf   :  { %1197 = vmatpush1.msra.mxu1 %v867_v49  ;;  %1121 = vmatprep.subr.mxu0 %v862_v50 }
  0xc0   :  { %1198 = vmatprep.subr.mxu1 %v864_v51  ;;  %1122 = vmatpush1.msra.mxu0 %v861_v52 }
  0xc1   :  { %1199 = vmatpush1.msra.mxu1 %v863_v53  ;;  %1123 = vmatprep.subr.mxu0 %v858_v54 }
  0xc2   :  { %1200 = vmatprep.subr.mxu1 %v860_v55  ;;  %1124 = vmatpush1.msra.mxu0 %v857_v56 }
  0xc3   :  { %1201 = vmatpush1.msra.mxu1 %v859_v57  ;;  %1125 = vmatprep.subr.mxu0 %v854_v58 }
  0xc4   :  { %1202 = vmatprep.subr.mxu1 %v856_v59  ;;  %1126 = vmatpush1.msra.mxu0 %v853_v60 }
  0xc5   :  { %1203 = vmatpush1.msra.mxu1 %v855_v61  ;;  %1127 = vmatprep.subr.mxu0 %v850_v62 }
  0xc6   :  { %1204 = vmatprep.subr.mxu1 %v852_v63  ;;  %1128 = vmatpush1.msra.mxu0 %v849_v0  ;;  %v1321_v63 = vld [vmem:[#allocation11 + $0x70] sm:$0xff] }
  0xc7   :  { %1205 = vmatpush1.msra.mxu1 %v851_v1  ;;  %1129 = vmatprep.subr.mxu0 %v846_v2  ;;  %v1320_v1 = vld [vmem:[#allocation11 + $0x68] sm:$0xff]  ;;  %v1319_v2 = vld [vmem:[#allocation11 + $0x60] sm:$0xff] }
  0xc8   :  { %1206 = vmatprep.subr.mxu1 %v848_v3  ;;  %1130 = vmatpush1.msra.mxu0 %v845_v4  ;;  %v1318_v3 = vld [vmem:[#allocation11 + $0x58] sm:$0xff]  ;;  %v1317_v4 = vld [vmem:[#allocation11 + $0x50] sm:$0xff] }
  0xc9   :  { %1207 = vmatpush1.msra.mxu1 %v847_v5  ;;  %1131 = vmatprep.subr.mxu0 %v842_v6  ;;  %v1316_v5 = vld [vmem:[#allocation11 + $0x48] sm:$0xff]  ;;  %v1314_v6 = vld [vmem:[#allocation11 + $0x38] sm:$0xff] }
  0xca   :  { %1208 = vmatprep.subr.mxu1 %v844_v7  ;;  %1132 = vmatpush1.msra.mxu0 %v841_v8  ;;  %v1313_v7 = vld [vmem:[#allocation11 + $0x30] sm:$0xff]  ;;  %v1312_v8 = vld [vmem:[#allocation11 + $0x28] sm:$0xff] }
  0xcb   :  { %1209 = vmatpush1.msra.mxu1 %v843_v9  ;;  %1133 = vmatprep.subr.mxu0 %v838_v10  ;;  %v1311_v9 = vld [vmem:[#allocation11 + $0x20] sm:$0xff]  ;;  %v1310_v10 = vld [vmem:[#allocation11 + $0x18] sm:$0xff] }
  0xcc   :  { %1210 = vmatprep.subr.mxu1 %v840_v11  ;;  %1025 = vmatprep.mubr.f32.mxu0 %v1876_v25  ;;  %v1309_v11 = vld [vmem:[#allocation11 + $0x10] sm:$0xff] }
  0xcd   :  { %1134 = vmatpush1.msra.mxu0 %v837_v12  ;;  %1211 = vmatpush1.msra.mxu1 %v839_v13  ;;  %v1308_v12 = vld [vmem:[#allocation11 + $0x8] sm:$0xff]  ;;  %v1307_v13 = vld [vmem:[#allocation11] sm:$0xff] }
  0xce   :  { %1026 = vmatmul.mubr.f32.gmra.mxu0 %v890_v14  ;;  %1135 = vmatprep.subr.mxu0 %v834_v15  ;;  %v1265_v15 = vlaneseq }
  0xcf   :  { %1212 = vmatprep.subr.mxu1 %v836_v16  ;;  %1102 = vmatprep.mubr.f32.mxu1 %v1876_v25 }
  0xd0   :  { %1136 = vmatpush1.msra.mxu0 %v833_v17  ;;  %1213 = vmatpush1.msra.mxu1 %v835_v18  ;;  %v1266_v18 = vshrl.u32 %v1265_v15, 7 }
  0xd1   :  { %1103 = vmatmul.mubr.f32.gmra.mxu1 %v890_v14  ;;  %1137 = vmatprep.subr.mxu0 %v830_v19 }
  0xd2   :  { %1214 = vmatprep.subr.mxu1 %v832_v20  ;;  %1138 = vmatpush1.msra.mxu0 %v829_v21 }
  0xd3   :  { %1215 = vmatpush1.msra.mxu1 %v831_v22  ;;  %1139 = vmatprep.subr.mxu0 %v826_v23  ;;  %v1267_v22 = vsub.s32 0, %v1266_v18 }
  0xd4   :  { %1216 = vmatprep.subr.mxu1 %v828_v24  ;;  %1140 = vmatpush1.msra.mxu0 %v825_v26  ;;  %v1263_v24 = vld [vmem:[%s1987_s6] sm:$0xf]  ;;  %v1275_v26 = vsub.s32 2, %v1266_v18 }
  0xd5   :  { %1173 = vmatprep.mubr.f32.mxu0 %v1876_v25  ;;  %1217 = vmatpush1.msra.mxu1 %v827_v27  ;;  %v1271_v27 = vsub.s32 1, %v1266_v18 }
  0xd6   :  { %1250 = vmatprep.mubr.f32.mxu1 %v1876_v25  ;;  %1599 = vmatprep.subr.mxu0 %v1322_v28 }
 0x131   :  { %v1509_v29 = vpop.f32.mrf.mxu0 }
 0x132   :  { %v1531_v30 = vpop.f32.mrf.mxu1 }
 0x133   :  { %v1510_v31 = vpop.f32.mrf.mxu0 }
 0x134   :  { %v1532_v32 = vpop.f32.mrf.mxu1  ;;  %v1511_v34 = vadd.f32 %v1510_v31, %v1509_v29  ;;  %v1279_v29 = vsub.s32 3, %v1266_v18 }
 0x135   :  { %v1512_v33 = vpop.f32.mrf.mxu0  ;;  %v1533_v39 = vadd.f32 %v1532_v32, %v1531_v30  ;;  %v1268_v30 = vrot.slane %v1263_v24, %v1267_v22 }
 0x136   :  { %v1534_v35 = vpop.f32.mrf.mxu1  ;;  %v694_v38 = vadd.f32 %v1511_v34, %v1427_v36 }
 0x137   :  { %v1513_v37 = vpop.f32.mrf.mxu0 }
 0x138   :  { %v1514_v40 = vadd.f32 %v1513_v37, %v1512_v33  ;;  %v1535_v41 = vpop.f32.mrf.mxu1  ;;  %v735_v45 = vadd.f32 %v1533_v39, %v694_v38  ;;  %v1280_v39 = vrot.slane %v1263_v24, %v1279_v29 }
 0x139   :  { %v1536_v50 = vadd.f32 %v1535_v41, %v1534_v35  ;;  %v1276_v35 = vrot.slane %v1263_v24, %v1275_v26 }
 0x13a   :  { %v697_v46 = vadd.f32 %v1514_v40, %v1427_v36  ;;  %v1272_v36 = vrot.slane %v1263_v24, %v1271_v27 }
 0x13c   :  { %v738_v55 = vadd.f32 %v1536_v50, %v697_v46 }
 0x151   :  { %v1553_v42 = vpop.f32.mrf.mxu0 }
 0x152   :  { %v1575_v43 = vpop.f32.mrf.mxu1 }
 0x153   :  { %v1554_v44 = vpop.f32.mrf.mxu0 }
 0x154   :  { %v1555_v47 = vadd.f32 %v1554_v44, %v1553_v42  ;;  %v1576_v48 = vpop.f32.mrf.mxu1 }
 0x155   :  { %v1556_v49 = vpop.f32.mrf.mxu0  ;;  %v1577_v52 = vadd.f32 %v1576_v48, %v1575_v43 }
 0x156   :  { %v776_v51 = vadd.f32 %v1555_v47, %v735_v45  ;;  %v1578_v53 = vpop.f32.mrf.mxu1 }
 0x157   :  { %v1557_v54 = vpop.f32.mrf.mxu0 }
 0x158   :  { %v817_v56 = vadd.f32 %v1577_v52, %v776_v51  ;;  %v1558_v57 = vadd.f32 %v1557_v54, %v1556_v49  ;;  %v1579_v58 = vpop.f32.mrf.mxu1 }
 0x159   :  { %v1580_v61 = vadd.f32 %v1579_v58, %v1578_v53 }
 0x15a   :  { %v823_v59 = vmax.f32 %v817_v56, 0.0  ;;  %v779_v60 = vadd.f32 %v1558_v57, %v738_v55 }
 0x15c   :  { %v820_v62 = vadd.f32 %v1580_v61, %v779_v60  ;;  %1174 = vmatmul.mubr.f32.vlgmr.msra.gmra.mxu0 %v823_v59  ;;  %1251 = vmatmul.mubr.f32.vlgmr.msra.gmra.mxu1 %v823_v59 }
 0x15d   :  { %1179 = vmatprep.mubr.f32.mxu0 %v1876_v25  ;;  %1256 = vmatprep.mubr.f32.mxu1 %v1876_v25  ;;  %v1315_v25 = vld [vmem:[#allocation11 + $0x40] sm:$0xff] }
 0x15e   :  { %v824_v0 = vmax.f32 %v820_v62, 0.0  ;;  %1600 = vmatpush3.msra.mxu0 %v1322_v28 }
 0x15f   :  { %1601 = vmatprep.subr.mxu0 %v1321_v63 }
 0x160   :  { %1180 = vmatmul.mubr.f32.gmra.mxu0 %v824_v0  ;;  %1257 = vmatmul.mubr.f32.gmra.mxu1 %v824_v0 }
 0x161   :  { %1602 = vmatpush3.msra.mxu0 %v1321_v63 }
 0x162   :  { %1603 = vmatprep.subr.mxu0 %v1320_v1 }
 0x163   :  { %1604 = vmatpush3.msra.mxu0 %v1320_v1 }
 0x164   :  { %1605 = vmatprep.subr.mxu0 %v1319_v2 }
 0x165   :  { %1606 = vmatpush3.msra.mxu0 %v1319_v2 }
 0x166   :  { %1607 = vmatprep.subr.mxu0 %v1318_v3 }
 0x167   :  { %1608 = vmatpush3.msra.mxu0 %v1318_v3 }
 0x168   :  { %1609 = vmatprep.subr.mxu0 %v1317_v4 }
 0x169   :  { %1610 = vmatpush3.msra.mxu0 %v1317_v4 }
 0x16a   :  { %1611 = vmatprep.subr.mxu0 %v1316_v5 }
 0x16b   :  { %1612 = vmatpush3.msra.mxu0 %v1316_v5 }
 0x16c   :  { %1613 = vmatprep.subr.mxu0 %v1315_v25 }
 0x16d   :  { %1614 = vmatpush3.msra.mxu0 %v1315_v25 }
 0x16e   :  { %1615 = vmatprep.subr.mxu0 %v1314_v6 }
 0x16f   :  { %1616 = vmatpush3.msra.mxu0 %v1314_v6 }
 0x170   :  { %1617 = vmatprep.subr.mxu0 %v1313_v7 }
 0x171   :  { %1618 = vmatpush3.msra.mxu0 %v1313_v7  ;;  %v1021_v16 = vpop.f32.mrf.mxu0  ;;  %v1492_v7 = vld [vmem:[%s1989_s8] ss:$0 sm:$0xff] }
 0x172   :  { %1619 = vmatprep.subr.mxu0 %v1312_v8 }
 0x173   :  { %1620 = vmatpush3.msra.mxu0 %v1312_v8  ;;  %v1023_v19 = vpop.f32.mrf.mxu0 }
 0x174   :  { %1621 = vmatprep.subr.mxu0 %v1311_v9  ;;  %v1098_v14 = vpop.f32.mrf.mxu1 }
 0x175   :  { %1622 = vmatpush3.msra.mxu0 %v1311_v9 }
 0x176   :  { %1623 = vmatprep.subr.mxu0 %v1310_v10  ;;  %v1100_v17 = vpop.f32.mrf.mxu1 }
 0x177   :  { %1624 = vmatpush3.msra.mxu0 %v1310_v10 }
 0x178   :  { %1625 = vmatprep.subr.mxu0 %v1309_v11 }
 0x179   :  { %1626 = vmatpush3.msra.mxu0 %v1309_v11 }
 0x17a   :  { %1627 = vmatprep.subr.mxu0 %v1308_v12 }
 0x17b   :  { %1628 = vmatpush3.msra.mxu0 %v1308_v12 }
 0x17c   :  { %1629 = vmatprep.subr.mxu0 %v1307_v13 }
 0x17d   :  { %1630 = vmatpush3.msra.mxu0 %v1307_v13 }
 0x18e   :  { %v1027_v21 = vpop.f32.mrf.mxu0 }
 0x190   :  { %v1029_v28 = vpop.f32.mrf.mxu0 }
 0x191   :  { %v1104_v20 = vpop.f32.mrf.mxu1 }
 0x193   :  { %v1106_v23 = vpop.f32.mrf.mxu1 }
 0x21c   :  { %v1175_v31 = vpop.f32.mrf.mxu0  ;;  %v1252_v32 = vpop.f32.mrf.mxu1 }
 0x21d   :  { %v1176_v33 = vadd.f32 %v1175_v31, %v1021_v16  ;;  %v1253_v34 = vadd.f32 %v1252_v32, %v1098_v14 }
 0x21e   :  { %v1177_v37 = vpop.f32.mrf.mxu0  ;;  %v1254_v38 = vpop.f32.mrf.mxu1 }
 0x21f   :  { %v1285_v40 = vadd.f32 %v1268_v30, %v1176_v33  ;;  %v1178_v41 = vadd.f32 %v1177_v37, %v1023_v19  ;;  %v1255_v42 = vadd.f32 %v1254_v38, %v1100_v17  ;;  %v1287_v45 = vadd.f32 %v1276_v35, %v1253_v34 }
 0x220   :  { %v1181_v43 = vpop.f32.mrf.mxu0  ;;  %v1258_v44 = vpop.f32.mrf.mxu1 }
 0x221   :  { %v1286_v46 = vadd.f32 %v1272_v36, %v1178_v41  ;;  %v1288_v47 = vadd.f32 %v1280_v39, %v1255_v42  ;;  %v1182_v48 = vadd.f32 %v1181_v43, %v1027_v21  ;;  %v1259_v49 = vadd.f32 %v1258_v44, %v1104_v20 }
 0x222   :  { %v1183_v50 = vpop.f32.mrf.mxu0  ;;  %v1260_v51 = vpop.f32.mrf.mxu1  ;;  %v1293_v52 = vmax.f32 %v1285_v40, 0.0  ;;  %v1295_v57 = vmax.f32 %v1287_v45, 0.0 }
 0x223   :  { %v1294_v53 = vmax.f32 %v1286_v46, 0.0  ;;  %v1184_v54 = vadd.f32 %v1183_v50, %v1029_v28  ;;  %v1261_v55 = vadd.f32 %v1260_v51, %v1106_v23  ;;  %v1289_v56 = vadd.f32 %v1268_v30, %v1182_v48 }
 0x224   :  { %v1291_v59 = vadd.f32 %v1276_v35, %v1259_v49  ;;  %v1296_v61 = vmax.f32 %v1288_v47, 0.0 }
 0x225   :  { %v1301_v58 = vmax.f32 %v1293_v52, %v1294_v53  ;;  %v1290_v60 = vadd.f32 %v1272_v36, %v1184_v54  ;;  %v1297_v62 = vmax.f32 %v1289_v56, 0.0  ;;  %v1292_v0 = vadd.f32 %v1280_v39, %v1261_v55 }
 0x226   :  { %v1299_v2 = vmax.f32 %v1291_v59, 0.0 }
 0x227   :  { %v1298_v63 = vmax.f32 %v1290_v60, 0.0  ;;  %v1303_v1 = vmax.f32 %v1301_v58, %v1295_v57  ;;  %v1300_v5 = vmax.f32 %v1292_v0, 0.0 }
 0x229   :  { %v1302_v3 = vmax.f32 %v1297_v62, %v1298_v63  ;;  %v1305_v4 = vmax.f32 %v1303_v1, %v1296_v61 }
 0x22b   :  { %v1304_v25 = vmax.f32 %v1302_v3, %v1299_v2  ;;  %1631 = vmatprep.mubr.f32.mxu0 %v1305_v4 }
 0x22d   :  { %v1306_v6 = vmax.f32 %v1304_v25, %v1300_v5 }
 0x22f   :  { %1632 = vmatmul.mubr.f32.vlgmr.msra.gmra.mxu0 %v1306_v6 }
 0x2ef   :  { %v1633_v8 = vpop.f32.mrf.mxu0 }
 0x2f0   :  { %v1402_v9 = vadd.f32 %v1633_v8, %v1492_v7 }
 0x2f1   :  { %v1396_v10 = vpop.f32.mrf.mxu0 }
 0x2f2   :  { %1406 = vst [vmem:[#allocation13 + $0x8] sm:$0xff] %v1402_v9  ;;  %v1397_v11 = vadd.f32 %v1492_v7, %v1396_v10 }
 0x2f4   :  { %1405 = vst [vmem:[#allocation13] sm:$0xff] %v1397_v11 }
 0x2f5   :  { %1844 = shalt.err (!%p1841_p6)
}
 0x2f6   :  { %1418 = dma.vmem_to_hbm [thread:$0]  %s1413_s25, 256, %s1990_s9, [#allocation4], %s1864_s12, %s1864_s12, %s1865_s13  }
 0x2f7   :  { %1861 = dma.done.wait [#allocation4], 256  }
 0x2f8   :  { %1862 = vsyncadd [#allocation4], 4294967040 }
 0x2f9   :  { %1422 = vsyncpa [#allocation3], 1 }
 0x2fa   :  { %1423 = vsyncpa [#allocation6], 1 }
 0x2fb   :  { %1424 = vsyncpa [#allocation9], 1 }
 0x2fc   :  { %1425 = vsyncpa [#allocation12], 1 }
 0x2fd   :  { %1426 = vsyncpa [#allocation4], 1 }

</bundles_post_ra>
